<compile_context>
chip_gen: v6e
topology: v6e:2x2x1
jax: 0.10.0
libtpu: 0.0.40
codegen_flags: <defaults>
</compile_context>

<pallas_src>
import functools

import jax
import jax.numpy as jnp
from jax.experimental import pallas as pl
from jax.experimental.pallas import tpu as pltpu

_LANES = 128
_VMEM_BUDGET = 48 * 1024 * 1024  # safe on v7x (64 MiB physical); v5e/v6e have 128 MiB


def _lr_kernel(x_ref, w_ref, b_ref, o_ref):
    # x_ref: (nf, SB, 128) VMEM  -- batch packed dense onto sublanes x lanes
    # w_ref: (nf,) SMEM scalars; b_ref: (1,) SMEM scalar
    # o_ref: (SB, 128) VMEM     -- dense (8,128) output tiles, lane-dense stores
    nf = x_ref.shape[0]
    z = jnp.full(o_ref.shape, b_ref[0], dtype=jnp.float32)
    if nf <= 4:
        # Tiny nf: a short serial scalar*vector FMA chain on the VPU (no MXU --
        # an N=1 matmul would waste 127/128 of the systolic array).
        for f in range(nf):
            z = z + w_ref[f] * x_ref[f].astype(jnp.float32)
    else:
        # Larger nf: break the serial FMA chain into independent partial sums so
        # VALU latency is not the bottleneck.  (For nf >= ~128 an MXU formulation
        # would be preferable; not needed for this module's nf.)
        n_acc = 4
        parts = [z] + [jnp.zeros(o_ref.shape, jnp.float32) for _ in range(n_acc - 1)]
        for f in range(nf):
            parts[f % n_acc] = parts[f % n_acc] + w_ref[f] * x_ref[f].astype(jnp.float32)
        z = (parts[0] + parts[1]) + (parts[2] + parts[3])
    # sigmoid = 1 / (1 + exp(-z)): exp on the EUP, approximate reciprocal on the EUP
    # (keeps the VALU free -- the kernel stays HBM-bound even on v7x).
    o_ref[...] = pl.reciprocal(1.0 + jnp.exp(-z), approx=True).astype(o_ref.dtype)


def _pick_block_rows(r_p, nf, requested):
    """Rows of 128 samples per grid step (sublane-block size)."""
    if r_p <= 8:
        return r_p  # single (possibly partial) tile; full-extent block dim is legal
    # Double-buffered (nf input rows + 1 output row) of 128 f32 lanes per block row.
    vmem_cap_rows = (_VMEM_BUDGET - (4 << 20)) // (2 * (nf + 1) * _LANES * 4)
    # Keep >= 4 grid steps when there is enough work (feeds both v7x TensorCores and
    # keeps the double-buffered pipeline busy).
    sb = min(requested, vmem_cap_rows, max(8, pl.cdiv(r_p, 4)))
    return max(8, (sb // 8) * 8)


def _forward_packed(x_fm, w, b, block_rows):
    """x_fm: (nf, B) feature-major. Returns sigmoid(x @ w + b) flattened to (B,)."""
    nf, B = x_fm.shape
    pad = (-B) % _LANES
    if pad:
        # <=127 extra columns; fuses with the producer transpose / input DMA.
        x_fm = jnp.pad(x_fm, ((0, 0), (0, pad)))
    Bp = B + pad
    r_p = Bp // _LANES
    x3 = x_fm.reshape(nf, r_p, _LANES)           # free view: row-major reshape

    sb = _pick_block_rows(r_p, nf, block_rows)
    blk_bytes = (nf + 1) * sb * _LANES * 4
    vmem_limit = max(32 << 20, min(_VMEM_BUDGET, 2 * blk_bytes + (8 << 20)))

    w_row = w.reshape(nf).astype(jnp.float32)    # (nf,) -> SMEM scalars
    b_s = b.reshape(1).astype(jnp.float32)       # (1,)  -> SMEM scalar

    out = pl.pallas_call(
        _lr_kernel,
        out_shape=jax.ShapeDtypeStruct((r_p, _LANES), x_fm.dtype),
        grid=(pl.cdiv(r_p, sb),),                # non-dividing last block handled by Pallas
        in_specs=[
            pl.BlockSpec((nf, sb, _LANES), lambda i: (0, i, 0)),
            pl.BlockSpec(memory_space=pltpu.MemorySpace.SMEM),
            pl.BlockSpec(memory_space=pltpu.MemorySpace.SMEM),
        ],
        out_specs=pl.BlockSpec((sb, _LANES), lambda i: (i, 0)),
        compiler_params=pltpu.CompilerParams(
            dimension_semantics=("parallel",),       # shard batch tiles across TCs (v7x)
            allow_input_fusion=[True, False, False], # let the transpose/pad fuse into the DMA
            vmem_limit_bytes=vmem_limit,
        ),
    )(x3, w_row, b_s)

    # Free reshape; the [:B] slice only copies when B is not a multiple of 128.
    return out.reshape(-1)[:B]


@functools.partial(jax.jit, static_argnames=("block_rows",))
def logistic_regression(x, w, b, *, block_rows=8192):
    """Matches LogisticRegression.forward: x (B, nf) -> sigmoid(x @ w + b), shape (B, 1)."""
    B, nf = x.shape
    # Feature-major view of x; with allow_input_fusion XLA can fold this transpose
    # (and the lane pad / reshape) into the pallas_call input instead of a separate
    # HBM pass.  Producers that can supply (nf, B) directly should use
    # logistic_regression_feature_major below.
    y = _forward_packed(x.T, w, b, block_rows)
    return y.reshape(B, 1)


@functools.partial(jax.jit, static_argnames=("block_rows",))
def logistic_regression_feature_major(x_fm, w, b, *, block_rows=8192):
    """Preferred producer layout: x_fm (nf, B). Returns predictions with shape (B,)."""
    return _forward_packed(x_fm, w, b, block_rows)


if __name__ == "__main__":
    nf = 2  # matches LogisticRegression(nf=2): nn.Linear(2, 1)

    key = jax.random.PRNGKey(0)
    kx, kw, kb, kx2, kx3 = jax.random.split(key, 5)

    # Deterministic parameter init mimicking nn.Linear's U(-1/sqrt(nf), 1/sqrt(nf)).
    bound = 1.0 / jnp.sqrt(jnp.float32(nf))
    w = jax.random.uniform(kw, (nf, 1), jnp.float32, -bound, bound)   # (nf, 1) = W^T
    b = jax.random.uniform(kb, (1, 1), jnp.float32, -bound, bound)    # (1, 1)

    # Tolerance accounts for the approximate (EUP) reciprocal in the sigmoid.
    TOL = 1e-2

    # Small batch: single partial tile, exercises the lane-pad path.
    x = jax.random.normal(kx, (8, nf), jnp.float32)
    out = logistic_regression(x, w, b)
    jax.block_until_ready(out)
    ref = jax.nn.sigmoid(x @ w + b)
    assert out.shape == (8, 1)
    assert jnp.allclose(out, ref, atol=TOL, rtol=TOL)

    # Ragged larger batch: multiple sublane blocks + non-dividing last block + lane pad.
    x2 = jax.random.normal(kx2, (3000, nf), jnp.float32)
    out2 = logistic_regression(x2, w, b)
    jax.block_until_ready(out2)
    ref2 = jax.nn.sigmoid(x2 @ w + b)
    assert out2.shape == (3000, 1)
    assert jnp.allclose(out2, ref2, atol=TOL, rtol=TOL)

    # Feature-major fast path, batch an exact multiple of 128 (no pad, no slice copy).
    x3 = jax.random.normal(kx3, (nf, 2048), jnp.float32)
    out3 = logistic_regression_feature_major(x3, w, b)
    jax.block_until_ready(out3)
    ref3 = jax.nn.sigmoid(x3.T @ w + b).reshape(-1)
    assert out3.shape == (2048,)
    assert jnp.allclose(out3, ref3, atol=TOL, rtol=TOL)

    print("KERNEL_OK")
</pallas_src>

<mosaic_0001>
module attributes {stable_mosaic.version = 11 : i64} {
  func.func @_lr_kernel(%arg0: i32, %arg1: memref<2x1x128xf32, #tpu.memory_space<vmem>>, %arg2: memref<2xf32, #tpu.memory_space<smem>>, %arg3: memref<1xf32, #tpu.memory_space<smem>>, %arg4: memref<1x128xf32, #tpu.memory_space<vmem>>) attributes {dimension_semantics = [#tpu.dimension_semantics<parallel>], iteration_bounds = array<i64: 1>, scalar_prefetch = 0 : i64, scratch_operands = 0 : i64, tpu.core_type = #tpu.core_type<tc>, window_params = [{transform_indices = @transform_0, window_bounds = array<i64: 2, 1, 128>}, {transform_indices = @transform_1, window_bounds = array<i64: 2>}, {transform_indices = @transform_2, window_bounds = array<i64: 1>}, {transform_indices = @transform_3, window_bounds = array<i64: 1, 128>}]} {
    %c0 = arith.constant 0 : index
    %0 = memref.load %arg3[%c0] : memref<1xf32, #tpu.memory_space<smem>>
    %1 = vector.broadcast %0 : f32 to vector<1x128xf32>
    %c0_0 = arith.constant 0 : index
    %2 = memref.load %arg2[%c0_0] : memref<2xf32, #tpu.memory_space<smem>>
    %c0_1 = arith.constant 0 : index
    %c0_2 = arith.constant 0 : index
    %c0_3 = arith.constant 0 : index
    %3 = vector.load %arg1[%c0_1, %c0_2, %c0_3] : memref<2x1x128xf32, #tpu.memory_space<vmem>>, vector<1x1x128xf32>
    %4 = vector.shape_cast %3 : vector<1x1x128xf32> to vector<1x128xf32>
    %5 = vector.broadcast %2 : f32 to vector<1x128xf32>
    %6 = arith.mulf %5, %4 : vector<1x128xf32>
    %7 = arith.addf %1, %6 : vector<1x128xf32>
    %c1 = arith.constant 1 : index
    %8 = memref.load %arg2[%c1] : memref<2xf32, #tpu.memory_space<smem>>
    %c1_4 = arith.constant 1 : index
    %c0_5 = arith.constant 0 : index
    %c0_6 = arith.constant 0 : index
    %9 = vector.load %arg1[%c1_4, %c0_5, %c0_6] : memref<2x1x128xf32, #tpu.memory_space<vmem>>, vector<1x1x128xf32>
    %10 = vector.shape_cast %9 : vector<1x1x128xf32> to vector<1x128xf32>
    %11 = vector.broadcast %8 : f32 to vector<1x128xf32>
    %12 = arith.mulf %11, %10 : vector<1x128xf32>
    %13 = arith.addf %7, %12 : vector<1x128xf32>
    %cst = arith.constant 0.000000e+00 : f32
    %14 = vector.broadcast %cst : f32 to vector<1x128xf32>
    %15 = arith.subf %14, %13 : vector<1x128xf32>
    %16 = math.exp %15 : vector<1x128xf32>
    %cst_7 = arith.constant 1.000000e+00 : f32
    %17 = vector.broadcast %cst_7 : f32 to vector<1x128xf32>
    %18 = arith.addf %17, %16 : vector<1x128xf32>
    %19 = tpu.reciprocal %18 {approx = true} : vector<1x128xf32> -> vector<1x128xf32>
    %c0_8 = arith.constant 0 : index
    %c0_9 = arith.constant 0 : index
    %20 = vector.load %arg4[%c0_8, %c0_9] : memref<1x128xf32, #tpu.memory_space<vmem>>, vector<1x128xf32>
    tpu.vector_store %arg4[%c0_8, %c0_9], %19 {strides = array<i32>} : memref<1x128xf32, #tpu.memory_space<vmem>>, vector<1x128xf32>,
    return
  }
  func.func @transform_0(%arg0: i32) -> (i32, i32, i32) {
    %c0_i32 = arith.constant 0 : i32
    %c0_i32_0 = arith.constant 0 : i32
    %c0_i32_1 = arith.constant 0 : i32
    return %c0_i32, %arg0, %c0_i32_0 : i32, i32, i32
  }
  func.func @transform_1(%arg0: i32) -> i32 {
    %c0_i32 = arith.constant 0 : i32
    %c0_i32_0 = arith.constant 0 : i32
    return %c0_i32 : i32
  }
  func.func @transform_2(%arg0: i32) -> i32 {
    %c0_i32 = arith.constant 0 : i32
    %c0_i32_0 = arith.constant 0 : i32
    return %c0_i32 : i32
  }
  func.func @transform_3(%arg0: i32) -> (i32, i32) {
    %c0_i32 = arith.constant 0 : i32
    %c0_i32_0 = arith.constant 0 : i32
    return %arg0, %c0_i32 : i32, i32
  }
}

</mosaic_0001>

<bundles_post_ra>
// kernel: logistic_regression.1
= control target key start
LH: loop header
LB: loop body
LE: loop exit
PB: predicated region body
PF: predicated region fallthrough
CT: control target
= control target key end

     0   :  { %9 = vsyncpa [#allocation4], 0  ;;  %s109_s0 = inlined_call_operand.vmem [shape: f32[2,1,128], index: 0, kind: input, shape index: {}]   ;;  %s110_s1 = inlined_call_operand.vmem [shape: f32[2], index: 1, kind: input, shape index: {}]   ;;  %s111_s2 = inlined_call_operand.<no memory space> [shape: f32[1], index: 2, kind: input, shape index: {}]   ;;  %s112_s3 = inlined_call_operand.vmem [shape: f32[1,128], index: 3, kind: output, shape index: {}]  }
   0x1   :  { %s18_s14 = sshll.u32 %s110_s1, 4  ;;  %s19_s14 = int_to_ptr.vmem [resolvable:$true] %s18_s14 }
   0x2   :  { %s59_s15 = scalar_lea.vmem %s19_s14, 16  ;;  %p64_p1 = scmp.lt.s32.totalorder %s19_s14, %s19_s14 }
   0x3   :  { %p60_p0 = scmp.ne.s32.totalorder %s19_s14, %s59_s15  ;;  %p65_p2 = scmp.lt.s32.totalorder %s59_s15, %s59_s15 }
   0x5   :  { %p66_p3 = por %p65_p2, %p64_p1 }
   0x7   :  { %p67_p4 = pnand %p66_p3, %p60_p0 }
   0x9   :  { %70 = shalt.err (!%p67_p4)
}
   0xa   :  { %s73_s16 = smov [#allocation3]  }
   0xb   :  { %21 = dma.vmem_to_smem %s19_s14, 16, %s73_s16, [#allocation4]  }
   0xc   :  { %71 = dma.done.wait [#allocation4], 16  }
   0xd   :  { %72 = vsyncadd [#allocation4], 4294967280 }
   0xe   :  { %27 = sfence }
   0xf   :  { %s30_s17 = sld [smem:[#allocation3]]  ;;  %v31_v0 = vld [vmem:[%s109_s0] sm:$0x1]  ;;  %v53_v1 = vld [vmem:[%s109_s0 + $0x1] sm:$0x1]  ;;  %v29_v2 = vstv %s111_s2 }
  0x10   :  { %s52_s18 = sld [smem:[#allocation3 + $0x1]] }
  0x15   :  { %v32_v3 = vstv %s30_s17 }
  0x16   :  { %v33_v4 = vmul.f32 %v32_v3, %v31_v0  ;;  %v38_v5 = vstv %s52_s18 }
  0x17   :  { %v39_v6 = vmul.f32 %v53_v1, %v38_v5 }
  0x18   :  { %v34_v7 = vadd.f32 %v33_v4, %v29_v2 }
  0x1a   :  { %v40_v8 = vadd.f32 %v39_v6, %v34_v7 }
  0x1c   :  { %v41_v9 = vsub.f32 0.0, %v40_v8 }
  0x1e   :  { %v42_v10 = vmul.f32 1.442695, %v41_v9 }
  0x20   :  { %55 = vpow2.f32 %v42_v10 }
  0x2d   :  { %v56_v11 = vpop.eup %55 }
  0x2e   :  { %v44_v12 = vadd.f32 1.0, %v56_v11 }
  0x30   :  { %57 = vrcp.f32 %v44_v12 }
  0x3d   :  { %v58_v13 = vpop.eup %57 }
  0x3e   :  { %46 = vst [vmem:[%s112_s3] sm:$0x1] %v58_v13 }
  0x3f   :  { %51 = vsyncpa [#allocation4], 1 }

</bundles_post_ra>
